<compile_context>
chip_gen: v7x
topology: tpu7x:2x2x1
jax: 0.10.0
libtpu: 0.0.40
codegen_flags: <defaults>
</compile_context>

<pallas_src>
import functools

import jax
import jax.numpy as jnp
from jax.experimental import pallas as pl
from jax.experimental.pallas import tpu as pltpu

_BIG = 1e30        # finite sentinel for masked selects / running accumulators
_HALF_BIG = 5e29   # threshold used to detect "no positive / no negative"
_MIB = 1024 * 1024


def _hardest_triplet_kernel(
    preds_ref, targets_ref, rowsum_ref, pmin_ref, nmax_ref, *,
    margin, num_rows, num_cols, tile_rows, tiles_per_split, grid_rows,
    full_coverage, compute_dtype,
):
    s = pl.program_id(0)                     # split axis (megacore "parallel")
    i = pl.program_id(1)                     # row-tile axis within the split ("arbitrary")
    lb = s * tiles_per_split + i             # logical row-block index
    fallback = max(float(margin) - 1.0, 0.0)  # exact value for degenerate rows/cols

    @pl.when(i == 0)
    def _init():
        # Per-split partial accumulators live directly in the output blocks.
        rowsum_ref[...] = jnp.zeros(rowsum_ref.shape, rowsum_ref.dtype)
        pmin_ref[...] = jnp.full(pmin_ref.shape, _BIG, compute_dtype)
        nmax_ref[...] = jnp.full(nmax_ref.shape, -_BIG, compute_dtype)

    p = preds_ref[...].astype(compute_dtype)   # no-op when dtypes already match
    t = targets_ref[...]
    pos = t >= 0.5                             # matches `(targets >= 0.5)`
    big = jnp.asarray(_BIG, compute_dtype)
    neg_big = jnp.asarray(-_BIG, compute_dtype)

    def accumulate(masked):
        if masked:
            row_ids = lb * tile_rows + jax.lax.broadcasted_iota(
                jnp.int32, (tile_rows, 1), 0)
            valid = row_ids < num_rows
            p_pos = jnp.where(jnp.logical_and(pos, valid), p, big)
            p_neg = jnp.where(jnp.logical_and(jnp.logical_not(pos), valid), p, neg_big)
        else:
            valid = None
            p_pos = jnp.where(pos, p, big)
            p_neg = jnp.where(pos, neg_big, p)

        # ---- row direction: two lane-axis reductions, shared selects with col pass ----
        raw_pos = jnp.min(p_pos, axis=1, keepdims=True).astype(jnp.float32)
        raw_neg = jnp.max(p_neg, axis=1, keepdims=True).astype(jnp.float32)
        degenerate = jnp.logical_or(raw_pos >= _HALF_BIG, raw_neg <= -_HALF_BIG)
        anchor = jnp.where(degenerate, jnp.float32(fallback),
                           jnp.maximum(raw_neg + margin - raw_pos, 0.0))
        if valid is not None:
            anchor = jnp.where(valid, anchor, 0.0)
        rowsum_ref[...] = rowsum_ref[...] + jnp.sum(anchor)

        # ---- column direction: elementwise folds into sublane-full (8, C) partials ----
        if tile_rows % 8 == 0:
            g = tile_rows // 8
            pf = jnp.min(p_pos.reshape(g, 8, num_cols), axis=0)
            nf = jnp.max(p_neg.reshape(g, 8, num_cols), axis=0)
        else:
            # single-tile path with num_rows not a multiple of 8
            pf = jnp.broadcast_to(jnp.min(p_pos, axis=0, keepdims=True), (8, num_cols))
            nf = jnp.broadcast_to(jnp.max(p_neg, axis=0, keepdims=True), (8, num_cols))
        pmin_ref[0] = jnp.minimum(pmin_ref[0], pf)
        nmax_ref[0] = jnp.maximum(nmax_ref[0], nf)

    if full_coverage:
        # Statically known: every tile is full and in range -> unmasked fast path only.
        accumulate(masked=False)
    else:
        needs_mask = (lb * tile_rows + tile_rows) > num_rows

        @pl.when(needs_mask)
        def _masked():
            accumulate(masked=True)

        @pl.when(jnp.logical_not(needs_mask))
        def _unmasked():
            accumulate(masked=False)


def _vmem_config():
    """(tile_budget_bytes, vmem_limit_bytes), generation-aware but conservative."""
    try:
        cap = int(pltpu.get_tpu_info().vmem_capacity_bytes)
    except Exception:
        cap = 64 * _MIB   # safe everywhere (v7x physical VMEM is 64 MiB)
    # Scoped-VMEM limit for this kernel: well under physical on every generation
    # (v5e/v6e 128 MiB physical -> 56 MiB; v7x 64 MiB physical -> 48 MiB).
    limit = min(cap * 3 // 4, 56 * _MIB)
    tile_budget = max(8 * _MIB, limit - 8 * _MIB)   # headroom for outputs / bookkeeping
    return tile_budget, limit


def _choose_tile_rows(num_rows, num_cols, preds_itemsize, targets_itemsize,
                      compute_itemsize, tile_budget_bytes):
    # Held simultaneously per tile row: 2 double-buffered input streams
    # (2 bufs x (preds + targets)) plus ~3 full-tile temporaries in the body.
    bytes_per_row = num_cols * (2 * (preds_itemsize + targets_itemsize)
                                + 3 * compute_itemsize)
    max_rows = max(8, tile_budget_bytes // max(bytes_per_row, 1))
    # TODO(synk): for extremely wide C (tile_rows forced tiny) add a second
    # ("arbitrary") grid axis over 128-multiple column chunks carrying per-row
    # running min/max partials instead of shrinking tile_rows.
    if num_rows <= max_rows:
        return num_rows                      # single tile; block dim == full dim is legal
    return max(8, (max_rows // 8) * 8)       # tiled path: sublane multiple of 8


def hardest_triplet_margin_loss_pallas(preds, targets, margin, *,
                                       tile_rows=None, num_splits=None):
    """Fused bidirectional loss == (loss(p, t) + loss(p.T, t.T)) / 2 in one HBM pass."""
    if preds.ndim != 2 or preds.shape != targets.shape:
        raise ValueError("preds/targets must be 2-D arrays of identical shape")
    num_rows, num_cols = preds.shape
    # TODO(synk): for best lane utilisation pad num_cols to a multiple of 128 upstream
    # (in the producer); padding here would just add an extra HBM round-trip.

    # min/max/compare are exact in bf16, so bf16 inputs stay bf16 for the streamed
    # work; only the reduced values are upcast to f32 for the +-1 / margin math.
    compute_dtype = jnp.bfloat16 if preds.dtype == jnp.bfloat16 else jnp.float32
    compute_itemsize = 2 if compute_dtype == jnp.bfloat16 else 4

    tile_budget, vmem_limit = _vmem_config()
    if tile_rows is None:
        tile_rows = _choose_tile_rows(num_rows, num_cols, preds.dtype.itemsize,
                                      targets.dtype.itemsize, compute_itemsize,
                                      tile_budget)
    tile_rows = int(min(tile_rows, num_rows))
    if tile_rows != num_rows:
        tile_rows = max(8, (tile_rows // 8) * 8)
    grid_rows = pl.cdiv(num_rows, tile_rows)

    # Split the row range across the two v7x TensorCores ("parallel" leading axis);
    # serial (and essentially free) on single-TC v5e/v6e.
    if num_splits is None:
        num_splits = 2 if grid_rows >= 2 else 1
    num_splits = int(max(1, min(num_splits, grid_rows)))
    tiles_per_split = pl.cdiv(grid_rows, num_splits)
    full_coverage = (num_rows % tile_rows == 0) and (grid_rows % num_splits == 0)

    if grid_rows % num_splits == 0:
        def in_map(s, i):
            return (s * tiles_per_split + i, 0)
    else:
        # Out-of-range tiles of the last split are clamped to the last real block and
        # fully masked inside the kernel (they contribute nothing).
        def in_map(s, i):
            return (jnp.minimum(s * tiles_per_split + i, grid_rows - 1), 0)

    def out_map(s, i):
        return (s, 0, 0)

    kernel = functools.partial(
        _hardest_triplet_kernel,
        margin=float(margin), num_rows=num_rows, num_cols=num_cols,
        tile_rows=tile_rows, tiles_per_split=tiles_per_split, grid_rows=grid_rows,
        full_coverage=full_coverage, compute_dtype=compute_dtype)

    rowsum, pmin, nmax = pl.pallas_call(
        kernel,
        out_shape=(
            jax.ShapeDtypeStruct((num_splits, 1, 128), jnp.float32),     # row-loss partial sums
            jax.ShapeDtypeStruct((num_splits, 8, num_cols), compute_dtype),  # col positives min
            jax.ShapeDtypeStruct((num_splits, 8, num_cols), compute_dtype),  # col negatives max
        ),
        grid_spec=pltpu.PrefetchScalarGridSpec(
            num_scalar_prefetch=0,
            grid=(num_splits, tiles_per_split),
            in_specs=[
                pl.BlockSpec((tile_rows, num_cols), in_map),
                pl.BlockSpec((tile_rows, num_cols), in_map),
            ],
            out_specs=[
                pl.BlockSpec((1, 1, 128), out_map),
                pl.BlockSpec((1, 8, num_cols), out_map),
                pl.BlockSpec((1, 8, num_cols), out_map),
            ],
        ),
        compiler_params=pltpu.CompilerParams(
            dimension_semantics=("parallel", "arbitrary"),
            vmem_limit_bytes=int(vmem_limit),
        ),
    )(preds, targets)

    # Tiny O(C) epilogue: combine per-split partials and collapse the 8 sublanes once.
    fallback = max(float(margin) - 1.0, 0.0)
    pmin_c = jnp.min(pmin.astype(jnp.float32), axis=(0, 1))   # (C,)
    nmax_c = jnp.max(nmax.astype(jnp.float32), axis=(0, 1))   # (C,)
    degenerate = jnp.logical_or(pmin_c >= _HALF_BIG, nmax_c <= -_HALF_BIG)
    anchor_c = jnp.where(degenerate, jnp.float32(fallback),
                         jnp.maximum(nmax_c + margin - pmin_c, 0.0))
    loss_rows = jnp.sum(rowsum[:, 0, 0]) / (num_rows * margin)
    loss_cols = jnp.sum(anchor_c) / (num_cols * margin)
    return 0.5 * (loss_rows + loss_cols)


class HardestTripletMarginLoss:
    """JAX/Pallas port of the PyTorch module (forward pass only)."""

    def __init__(self, margin: float, hardest_fraction: float = 0.0):
        self.margin = margin
        self.hardest_fraction = hardest_fraction
        if hardest_fraction > 0.0:
            # TODO(synk): chunked_hardest_fraction path needs a data-dependent group-by
            # over unique positive-counts plus top-k; no clean static Pallas equivalent.
            raise NotImplementedError("hardest_fraction > 0.0 not implemented")

    def __call__(self, preds, targets):
        return hardest_triplet_margin_loss_pallas(preds, targets, self.margin)


def _reference_loss(preds, targets, margin):
    """Pure-JAX replica of the PyTorch reference (hardest_fraction == 0)."""
    def one_dir(p, t):
        pos = (t >= 0.5)
        max_p = jnp.max(p, axis=1, keepdims=True)
        min_p = jnp.min(p, axis=1, keepdims=True)
        hardest_pos = jnp.min(jnp.where(pos, p, max_p + 1.0), axis=1)
        hardest_neg = jnp.max(jnp.where(pos, min_p - 1.0, p), axis=1)
        anchor = jnp.maximum(hardest_neg + margin - hardest_pos, 0.0)
        return jnp.mean(anchor) / margin
    return (one_dir(preds, targets) + one_dir(preds.T, targets.T)) / 2.0


if __name__ == "__main__":
    key = jax.random.PRNGKey(0)
    k1, k2, k3, k4, k5, k6, k7 = jax.random.split(key, 7)
    margin = 0.2
    loss_fn = HardestTripletMarginLoss(margin=margin, hardest_fraction=0.0)

    # 1) Small single-tile path (num_docs, num_queries) = (24, 40).
    preds1 = jax.random.normal(k1, (24, 40), dtype=jnp.float32)
    targets1 = jax.random.uniform(k2, (24, 40), dtype=jnp.float32)
    out1 = loss_fn(preds1, targets1)
    jax.block_until_ready(out1)
    ref1 = _reference_loss(preds1, targets1, margin)
    assert jnp.allclose(out1, ref1, rtol=1e-5, atol=1e-5), (out1, ref1)

    # 2) Multi-tile, odd tile count: two splits, one clamped duplicate tile and a
    #    masked partial last tile (exercises the pl.when masked path).
    preds2 = jax.random.normal(k3, (40, 24), dtype=jnp.float32)
    targets2 = jax.random.uniform(k4, (40, 24), dtype=jnp.float32)
    out2 = hardest_triplet_margin_loss_pallas(preds2, targets2, margin, tile_rows=16)
    jax.block_until_ready(out2)
    ref2 = _reference_loss(preds2, targets2, margin)
    assert jnp.allclose(out2, ref2, rtol=1e-5, atol=1e-5), (out2, ref2)

    # 3) bf16 streaming path, even split, full coverage (reshape/fold column path).
    preds3 = jax.random.normal(k5, (64, 128), dtype=jnp.float32).astype(jnp.bfloat16)
    targets3 = jax.random.uniform(k6, (64, 128), dtype=jnp.float32)
    out3 = hardest_triplet_margin_loss_pallas(preds3, targets3, margin, tile_rows=16)
    jax.block_until_ready(out3)
    ref3 = _reference_loss(preds3.astype(jnp.float32), targets3, margin)
    assert jnp.allclose(out3, ref3, rtol=1e-4, atol=1e-4), (out3, ref3)

    # 4) Degenerate rows / columns (no-positive and no-negative fallback paths).
    base = (jax.random.uniform(k7, (16, 16)) >= 0.5).astype(jnp.float32)
    targets4 = base.at[0, :].set(0.0).at[1, :].set(1.0)   # row 0: all-neg, row 1: all-pos
    preds4 = jax.random.normal(k1, (16, 16), dtype=jnp.float32)
    out4a = loss_fn(preds4, targets4)
    out4b = loss_fn(preds4.T, targets4.T)                 # exercises column-side fallback
    jax.block_until_ready((out4a, out4b))
    ref4a = _reference_loss(preds4, targets4, margin)
    ref4b = _reference_loss(preds4.T, targets4.T, margin)
    assert jnp.allclose(out4a, ref4a, rtol=1e-5, atol=1e-5), (out4a, ref4a)
    assert jnp.allclose(out4b, ref4b, rtol=1e-5, atol=1e-5), (out4b, ref4b)

    print("KERNEL_OK")
</pallas_src>

<mosaic_0001>
module attributes {stable_mosaic.version = 11 : i64} {
  func.func @_hardest_triplet_kernel(%arg0: i32, %arg1: i32, %arg2: memref<24x40xf32, #tpu.memory_space<vmem>>, %arg3: memref<24x40xf32, #tpu.memory_space<vmem>>, %arg4: memref<1x1x128xf32, #tpu.memory_space<vmem>>, %arg5: memref<1x8x40xf32, #tpu.memory_space<vmem>>, %arg6: memref<1x8x40xf32, #tpu.memory_space<vmem>>) attributes {dimension_semantics = [#tpu.dimension_semantics<parallel>, #tpu.dimension_semantics<arbitrary>], iteration_bounds = array<i64: 1, 1>, scalar_prefetch = 0 : i64, scratch_operands = 0 : i64, tpu.core_type = #tpu.core_type<tc>, window_params = [{transform_indices = @transform_0, window_bounds = array<i64: 24, 40>}, {transform_indices = @transform_1, window_bounds = array<i64: 24, 40>}, {transform_indices = @transform_2, window_bounds = array<i64: 1, 1, 128>}, {transform_indices = @transform_3, window_bounds = array<i64: 1, 8, 40>}, {transform_indices = @transform_4, window_bounds = array<i64: 1, 8, 40>}]} {
    %c0_i32 = arith.constant 0 : i32
    %0 = arith.cmpi eq, %arg1, %c0_i32 : i32
    %1 = arith.extui %0 : i1 to i32
    %c0_i32_0 = arith.constant 0 : i32
    %2 = arith.cmpi ne, %1, %c0_i32_0 : i32
    scf.if %2 {
      %cst_34 = arith.constant 0.000000e+00 : f32
      %51 = vector.broadcast %cst_34 : f32 to vector<1x1x128xf32>
      %c0_35 = arith.constant 0 : index
      %c0_36 = arith.constant 0 : index
      %c0_37 = arith.constant 0 : index
      %52 = vector.load %arg4[%c0_35, %c0_36, %c0_37] : memref<1x1x128xf32, #tpu.memory_space<vmem>>, vector<1x1x128xf32>
      tpu.vector_store %arg4[%c0_35, %c0_36, %c0_37], %51 {strides = array<i32>} : memref<1x1x128xf32, #tpu.memory_space<vmem>>, vector<1x1x128xf32>,
      %cst_38 = arith.constant 1.000000e+30 : f32
      %53 = vector.broadcast %cst_38 : f32 to vector<1x8x40xf32>
      %c0_39 = arith.constant 0 : index
      %c0_40 = arith.constant 0 : index
      %c0_41 = arith.constant 0 : index
      %54 = vector.load %arg5[%c0_39, %c0_40, %c0_41] : memref<1x8x40xf32, #tpu.memory_space<vmem>>, vector<1x8x40xf32>
      tpu.vector_store %arg5[%c0_39, %c0_40, %c0_41], %53 {strides = array<i32>} : memref<1x8x40xf32, #tpu.memory_space<vmem>>, vector<1x8x40xf32>,
      %cst_42 = arith.constant -1.000000e+30 : f32
      %55 = vector.broadcast %cst_42 : f32 to vector<1x8x40xf32>
      %c0_43 = arith.constant 0 : index
      %c0_44 = arith.constant 0 : index
      %c0_45 = arith.constant 0 : index
      %56 = vector.load %arg6[%c0_43, %c0_44, %c0_45] : memref<1x8x40xf32, #tpu.memory_space<vmem>>, vector<1x8x40xf32>
      tpu.vector_store %arg6[%c0_43, %c0_44, %c0_45], %55 {strides = array<i32>} : memref<1x8x40xf32, #tpu.memory_space<vmem>>, vector<1x8x40xf32>,
    } else {
    }
    %c0 = arith.constant 0 : index
    %c0_1 = arith.constant 0 : index
    %3 = vector.load %arg2[%c0, %c0_1] : memref<24x40xf32, #tpu.memory_space<vmem>>, vector<24x40xf32>
    %c0_2 = arith.constant 0 : index
    %c0_3 = arith.constant 0 : index
    %4 = vector.load %arg3[%c0_2, %c0_3] : memref<24x40xf32, #tpu.memory_space<vmem>>, vector<24x40xf32>
    %cst = arith.constant 5.000000e-01 : f32
    %5 = vector.broadcast %cst : f32 to vector<24x40xf32>
    %6 = arith.cmpf oge, %4, %5 : vector<24x40xf32>
    %cst_4 = arith.constant 1.000000e+30 : f32
    %7 = vector.broadcast %cst_4 : f32 to vector<24x40xf32>
    %8 = arith.select %6, %3, %7 : vector<24x40xi1>, vector<24x40xf32>
    %cst_5 = arith.constant -1.000000e+30 : f32
    %9 = vector.broadcast %cst_5 : f32 to vector<24x40xf32>
    %10 = arith.select %6, %9, %3 : vector<24x40xi1>, vector<24x40xf32>
    %cst_6 = arith.constant dense<0x7F800000> : vector<24xf32>
    %11 = vector.multi_reduction <minimumf>, %8, %cst_6 [1] : vector<24x40xf32> to vector<24xf32>
    %12 = vector.shape_cast %11 : vector<24xf32> to vector<24x1xf32>
    %cst_7 = arith.constant dense<0xFF800000> : vector<24xf32>
    %13 = vector.multi_reduction <maximumf>, %10, %cst_7 [1] : vector<24x40xf32> to vector<24xf32>
    %14 = vector.shape_cast %13 : vector<24xf32> to vector<24x1xf32>
    %cst_8 = arith.constant 5.000000e+29 : f32
    %15 = vector.broadcast %cst_8 : f32 to vector<24x1xf32>
    %16 = arith.cmpf oge, %12, %15 : vector<24x1xf32>
    %cst_9 = arith.constant -5.000000e+29 : f32
    %17 = vector.broadcast %cst_9 : f32 to vector<24x1xf32>
    %18 = arith.cmpf ole, %14, %17 : vector<24x1xf32>
    %19 = arith.ori %16, %18 : vector<24x1xi1>
    %cst_10 = arith.constant 2.000000e-01 : f32
    %20 = vector.broadcast %cst_10 : f32 to vector<24x1xf32>
    %21 = arith.addf %14, %20 : vector<24x1xf32>
    %22 = arith.subf %21, %12 : vector<24x1xf32>
    %cst_11 = arith.constant 0.000000e+00 : f32
    %23 = vector.broadcast %cst_11 : f32 to vector<24x1xf32>
    %24 = arith.maximumf %22, %23 : vector<24x1xf32>
    %cst_12 = arith.constant 0.000000e+00 : f32
    %25 = vector.broadcast %cst_12 : f32 to vector<24x1xf32>
    %26 = arith.select %19, %25, %24 : vector<24x1xi1>, vector<24x1xf32>
    %c0_13 = arith.constant 0 : index
    %c0_14 = arith.constant 0 : index
    %c0_15 = arith.constant 0 : index
    %27 = vector.load %arg4[%c0_13, %c0_14, %c0_15] : memref<1x1x128xf32, #tpu.memory_space<vmem>>, vector<1x1x128xf32>
    %28 = vector.shape_cast %26 : vector<24x1xf32> to vector<1x24x1xf32>
    %cst_16 = arith.constant dense<0.000000e+00> : vector<1xf32>
    %29 = vector.multi_reduction <add>, %28, %cst_16 [1, 2] : vector<1x24x1xf32> to vector<1xf32>
    %30 = vector.shape_cast %29 : vector<1xf32> to vector<1x1x1xf32>
    %31 = vector.extract %30[0, 0, 0] : f32 from vector<1x1x1xf32>
    %32 = vector.broadcast %31 : f32 to vector<1x1x128xf32>
    %33 = arith.addf %27, %32 : vector<1x1x128xf32>
    %c0_17 = arith.constant 0 : index
    %c0_18 = arith.constant 0 : index
    %c0_19 = arith.constant 0 : index
    %34 = vector.load %arg4[%c0_17, %c0_18, %c0_19] : memref<1x1x128xf32, #tpu.memory_space<vmem>>, vector<1x1x128xf32>
    tpu.vector_store %arg4[%c0_17, %c0_18, %c0_19], %33 {strides = array<i32>} : memref<1x1x128xf32, #tpu.memory_space<vmem>>, vector<1x1x128xf32>,
    %35 = vector.shape_cast %8 : vector<24x40xf32> to vector<3x8x40xf32>
    %cst_20 = arith.constant dense<0x7F800000> : vector<8x40xf32>
    %36 = vector.multi_reduction <minimumf>, %35, %cst_20 [0] : vector<3x8x40xf32> to vector<8x40xf32>
    %37 = vector.shape_cast %10 : vector<24x40xf32> to vector<3x8x40xf32>
    %cst_21 = arith.constant dense<0xFF800000> : vector<8x40xf32>
    %38 = vector.multi_reduction <maximumf>, %37, %cst_21 [0] : vector<3x8x40xf32> to vector<8x40xf32>
    %c0_22 = arith.constant 0 : index
    %c0_23 = arith.constant 0 : index
    %c0_24 = arith.constant 0 : index
    %39 = vector.load %arg5[%c0_22, %c0_23, %c0_24] : memref<1x8x40xf32, #tpu.memory_space<vmem>>, vector<1x8x40xf32>
    %40 = vector.shape_cast %39 : vector<1x8x40xf32> to vector<8x40xf32>
    %41 = arith.minimumf %40, %36 : vector<8x40xf32>
    %c0_25 = arith.constant 0 : index
    %c0_26 = arith.constant 0 : index
    %c0_27 = arith.constant 0 : index
    %42 = vector.load %arg5[%c0_25, %c0_26, %c0_27] : memref<1x8x40xf32, #tpu.memory_space<vmem>>, vector<1x8x40xf32>
    %43 = vector.shape_cast %42 : vector<1x8x40xf32> to vector<8x40xf32>
    %44 = vector.shape_cast %41 : vector<8x40xf32> to vector<1x8x40xf32>
    tpu.vector_store %arg5[%c0_25, %c0_26, %c0_27], %44 {strides = array<i32>} : memref<1x8x40xf32, #tpu.memory_space<vmem>>, vector<1x8x40xf32>,
    %c0_28 = arith.constant 0 : index
    %c0_29 = arith.constant 0 : index
    %c0_30 = arith.constant 0 : index
    %45 = vector.load %arg6[%c0_28, %c0_29, %c0_30] : memref<1x8x40xf32, #tpu.memory_space<vmem>>, vector<1x8x40xf32>
    %46 = vector.shape_cast %45 : vector<1x8x40xf32> to vector<8x40xf32>
    %47 = arith.maximumf %46, %38 : vector<8x40xf32>
    %c0_31 = arith.constant 0 : index
    %c0_32 = arith.constant 0 : index
    %c0_33 = arith.constant 0 : index
    %48 = vector.load %arg6[%c0_31, %c0_32, %c0_33] : memref<1x8x40xf32, #tpu.memory_space<vmem>>, vector<1x8x40xf32>
    %49 = vector.shape_cast %48 : vector<1x8x40xf32> to vector<8x40xf32>
    %50 = vector.shape_cast %47 : vector<8x40xf32> to vector<1x8x40xf32>
    tpu.vector_store %arg6[%c0_31, %c0_32, %c0_33], %50 {strides = array<i32>} : memref<1x8x40xf32, #tpu.memory_space<vmem>>, vector<1x8x40xf32>,
    return
  }
  func.func @transform_0(%arg0: i32, %arg1: i32) -> (i32, i32) {
    %c1_i32 = arith.constant 1 : i32
    %0 = arith.muli %arg0, %c1_i32 : i32
    %1 = arith.addi %0, %arg1 : i32
    %c0_i32 = arith.constant 0 : i32
    %c0_i32_0 = arith.constant 0 : i32
    return %1, %c0_i32 : i32, i32
  }
  func.func @transform_1(%arg0: i32, %arg1: i32) -> (i32, i32) {
    %c1_i32 = arith.constant 1 : i32
    %0 = arith.muli %arg0, %c1_i32 : i32
    %1 = arith.addi %0, %arg1 : i32
    %c0_i32 = arith.constant 0 : i32
    %c0_i32_0 = arith.constant 0 : i32
    return %1, %c0_i32 : i32, i32
  }
  func.func @transform_2(%arg0: i32, %arg1: i32) -> (i32, i32, i32) {
    %c0_i32 = arith.constant 0 : i32
    %c0_i32_0 = arith.constant 0 : i32
    %c0_i32_1 = arith.constant 0 : i32
    return %arg0, %c0_i32, %c0_i32_0 : i32, i32, i32
  }
  func.func @transform_3(%arg0: i32, %arg1: i32) -> (i32, i32, i32) {
    %c0_i32 = arith.constant 0 : i32
    %c0_i32_0 = arith.constant 0 : i32
    %c0_i32_1 = arith.constant 0 : i32
    return %arg0, %c0_i32, %c0_i32_0 : i32, i32, i32
  }
  func.func @transform_4(%arg0: i32, %arg1: i32) -> (i32, i32, i32) {
    %c0_i32 = arith.constant 0 : i32
    %c0_i32_0 = arith.constant 0 : i32
    %c0_i32_1 = arith.constant 0 : i32
    return %arg0, %c0_i32, %c0_i32_0 : i32, i32, i32
  }
}

</mosaic_0001>

<bundles_post_ra>
// kernel: tpu_custom_call.1
= control target key start
LH: loop header
LB: loop body
LE: loop exit
PB: predicated region body
PF: predicated region fallthrough
CT: control target
= control target key end

     0   :  { %10 = vsyncpa [#allocation3], 0  ;;  %s426_s0 = inlined_call_operand.hbm [shape: f32[24,40], index: 0, kind: input, shape index: {}]   ;;  %s427_s1 = inlined_call_operand.hbm [shape: f32[24,40], index: 1, kind: input, shape index: {}]   ;;  %s428_s2 = inlined_call_operand.hbm [shape: f32[1,1,128], index: 2, kind: output, shape index: {0}]   ;;  %s429_s3 = inlined_call_operand.hbm [shape: f32[1,8,40], index: 3, kind: output, shape index: {1}]   ;;  %s430_s4 = inlined_call_operand.hbm [shape: f32[1,8,40], index: 4, kind: output, shape index: {2}]  }
   0x1   :  { %11 = vsyncpa [#allocation6], 0 }
   0x2   :  { %12 = vsyncpa [#allocation4], 0 }
   0x3   :  { %13 = vsyncpa [#allocation9], 0  ;;  %s321_s15 = smov [#allocation2]   ;;  %s203_s19 = scalar_lea.hbm %s426_s0, 384 }
   0x4   :  { %s23_s16 = sshll.u32 %s321_s15, 4  ;;  %p204_p0 = scmp.ne.s32.totalorder %s426_s0, %s203_s19  ;;  %s24_s16 = int_to_ptr.vmem [resolvable:$true] %s23_s16 }
   0x5   :  { %p207_p1 = scmp.lt.u32.totalorder %s203_s19, %s426_s0 }
   0x7   :  { %p209_p2 = pnand %p207_p1, %p204_p0 }
   0x9   :  { %212 = shalt.err (!%p209_p2)
}
   0xa   :  { %s213_s24 = scalar_lea.vmem %s24_s16, 384  ;;  %p218_p4 = scmp.lt.s32.totalorder %s24_s16, %s24_s16 }
   0xb   :  { %p214_p3 = scmp.ne.s32.totalorder %s24_s16, %s213_s24  ;;  %p219_p5 = scmp.lt.s32.totalorder %s213_s24, %s213_s24 }
   0xd   :  { %p220_p6 = por %p219_p5, %p218_p4 }
   0xf   :  { %p221_p7 = pnand %p220_p6, %p214_p3 }
  0x11   :  { %224 = shalt.err (!%p221_p7)
}
  0x12   :  { %s322_s25 = smov 128   ;;  %s323_s26 = smov 8  }
  0x13   :  { %29 = dma.hbm_to_vmem [thread:$0]  %s426_s0, 384, %s24_s16, [#allocation3], %s322_s25, %s322_s25, %s323_s26  }
  0x14   :  { %s324_s29 = smov [#allocation5]   ;;  %s225_s7 = scalar_lea.hbm %s427_s1, 384 }
  0x15   :  { %s39_s30 = sshll.u32 %s324_s29, 4  ;;  %p226_p8 = scmp.ne.s32.totalorder %s427_s1, %s225_s7  ;;  %s40_s30 = int_to_ptr.vmem [resolvable:$true] %s39_s30 }
  0x16   :  { %p229_p9 = scmp.lt.u32.totalorder %s225_s7, %s427_s1 }
  0x18   :  { %p231_p10 = pnand %p229_p9, %p226_p8 }
  0x1a   :  { %234 = shalt.err (!%p231_p10)
}
  0x1b   :  { %s235_s12 = scalar_lea.vmem %s40_s30, 384  ;;  %p240_p12 = scmp.lt.s32.totalorder %s40_s30, %s40_s30 }
  0x1c   :  { %p236_p11 = scmp.ne.s32.totalorder %s40_s30, %s235_s12  ;;  %p241_p13 = scmp.lt.s32.totalorder %s235_s12, %s235_s12 }
  0x1e   :  { %p242_p0 = por %p241_p13, %p240_p12 }
  0x20   :  { %p243_p1 = pnand %p242_p0, %p236_p11 }
  0x22   :  { %246 = shalt.err (!%p243_p1)
}
  0x23   :  { %45 = dma.hbm_to_vmem [thread:$0]  %s427_s1, 384, %s40_s30, [#allocation6], %s322_s25, %s322_s25, %s323_s26  }
  0x24   :  { %313 = dma.done.wait [#allocation3], 384  }
  0x25   :  { %314 = vsyncadd [#allocation3], 4294966912 }
  0x26   :  { %315 = dma.done.wait [#allocation6], 384  }
  0x27   :  { %316 = vsyncadd [#allocation6], 4294966912  ;;  %vm61_vm0 = vcmask 326656   ;;  %v325_v0 = vmov -1e+30   ;;  %v64_v2 = vld [vmem:[#allocation2] sm:$0xff] }
  0x28   :  { %63 = vst.msk [vmem:[#allocation10] sm:$0xff] %vm61_vm0, %v325_v0  ;;  %v326_v1 = vmov 1e+30   ;;  %v67_v3 = vld [vmem:[#allocation5] sm:$0xff]  ;;  %v65_v4 = vld [vmem:[#allocation2 + $0x8] sm:$0xff]  ;;  %v68_v5 = vld [vmem:[#allocation5 + $0x8] sm:$0xff] }
  0x29   :  { %62 = vst.msk [vmem:[#allocation8] sm:$0xff] %vm61_vm0, %v326_v1  ;;  %vm70_vm1 = vcmp.ge.f32.partialorder %v67_v3, 0.5  ;;  %v66_v6 = vld [vmem:[#allocation2 + $0x10] sm:$0xff]  ;;  %v69_v7 = vld [vmem:[#allocation5 + $0x10] sm:$0xff]  ;;  %vm71_vm2 = vcmp.ge.f32.partialorder %v68_v5, 0.5  ;;  %vm120_vm10 = vcmask 7168  }
  0x2a   :  { %v76_v8 = vsel %vm70_vm1, -1e+30, %v64_v2  ;;  %v73_v9 = vsel %vm70_vm1, %v64_v2, 1e+30  ;;  %vm72_vm3 = vcmp.ge.f32.partialorder %v69_v7, 0.5  ;;  %v327_v51 = vmov 0.0  }
  0x2b   :  { %v89_v10 = vsel %vm61_vm0, %v76_v8, -inf  ;;  %v80_v11 = vsel %vm61_vm0, %v73_v9, inf  ;;  %v77_v12 = vsel %vm71_vm2, -1e+30, %v65_v4  ;;  %v74_v13 = vsel %vm71_vm2, %v65_v4, 1e+30 }
  0x2c   :  { %90 = vmax.xlane.f32.xlu0 %v89_v10  ;;  %81 = vmin.xlane.f32.xlu1 %v80_v11  ;;  %v92_v14 = vsel %vm61_vm0, %v77_v12, -inf  ;;  %v83_v15 = vsel %vm61_vm0, %v74_v13, inf  ;;  %v78_v16 = vsel %vm72_vm3, -1e+30, %v66_v6  ;;  %v75_v19 = vsel %vm72_vm3, %v66_v6, 1e+30 }
  0x2d   :  { %v140_v17 = vmax.f32 %v89_v10, %v92_v14  ;;  %v138_v18 = vmin.f32 %v80_v11, %v83_v15  ;;  %v95_v20 = vsel %vm61_vm0, %v78_v16, -inf  ;;  %v86_v22 = vsel %vm61_vm0, %v75_v19, inf  ;;  %60 = vst [vmem:[#allocation7] sm:$0x1] %v327_v51  ;;  %s328_s1 = smov [#allocation8]  }
  0x2e   :  { %s164_s14 = sshll.u32 %s328_s1, 4  ;;  %s165_s14 = int_to_ptr.vmem [resolvable:$true] %s164_s14 }
  0x2f   :  { %v145_v21 = vld [vmem:[#allocation10] sm:$0xff]  ;;  %v141_v24 = vmax.f32 %v140_v17, %v95_v20  ;;  %v139_v25 = vmin.f32 %v138_v18, %v86_v22  ;;  %s247_s15 = scalar_lea.vmem %s165_s14, 128  ;;  %p252_p3 = scmp.lt.s32.totalorder %s165_s14, %s165_s14 }
  0x30   :  { %v142_v23 = vld [vmem:[#allocation8] sm:$0xff]  ;;  %93 = vmax.xlane.f32.xlu0 %v92_v14  ;;  %84 = vmin.xlane.f32.xlu1 %v83_v15  ;;  %p248_p2 = scmp.ne.s32.totalorder %s165_s14, %s247_s15  ;;  %p253_p4 = scmp.lt.s32.totalorder %s247_s15, %s247_s15 }
  0x31   :  { %v146_v26 = vmax.f32 %v145_v21, %v141_v24  ;;  %v143_v27 = vmin.f32 %v142_v23, %v139_v25 }
  0x32   :  { %p254_p5 = por %p253_p4, %p252_p3 }
  0x33   :  { %147 = vst.msk [vmem:[#allocation10] sm:$0xff] %vm61_vm0, %v146_v26  ;;  %144 = vst.msk [vmem:[#allocation8] sm:$0xff] %vm61_vm0, %v143_v27 }
  0x34   :  { %96 = vmax.xlane.f32.xlu0 %v95_v20  ;;  %87 = vmin.xlane.f32.xlu1 %v86_v22  ;;  %p255_p6 = pnand %p254_p5, %p248_p2 }
  0xb9   :  { %v91_v28 = vpop.xlane.xlu0 %90  ;;  %v82_v29 = vpop.xlane.xlu1 %81 }
  0xba   :  { %v107_v30 = vadd.f32 0.2, %v91_v28  ;;  %vm101_vm4 = vcmp.le.f32.partialorder %v91_v28, -5e+29  ;;  %vm98_vm5 = vcmp.ge.f32.partialorder %v82_v29, 5e+29 }
  0xbb   :  { %vm104_vm8 = vmor %vm98_vm5, %vm101_vm4 }
  0xbc   :  { %v110_v31 = vsub.f32 %v107_v30, %v82_v29 }
  0xbd   :  { %v94_v32 = vpop.xlane.xlu0 %93  ;;  %v85_v33 = vpop.xlane.xlu1 %84 }
  0xbe   :  { %v108_v34 = vadd.f32 0.2, %v94_v32  ;;  %v113_v35 = vmax.f32 %v110_v31, 0.0  ;;  %vm102_vm6 = vcmp.le.f32.partialorder %v94_v32, -5e+29 }
  0xbf   :  { %vm99_vm7 = vcmp.ge.f32.partialorder %v85_v33, 5e+29 }
  0xc0   :  { %v111_v36 = vsub.f32 %v108_v34, %v85_v33  ;;  %v116_v41 = vsel %vm104_vm8, 0.0, %v113_v35  ;;  %vm105_vm9 = vmor %vm99_vm7, %vm102_vm6 }
  0xc1   :  { %v97_v37 = vpop.xlane.xlu0 %96  ;;  %v88_v38 = vpop.xlane.xlu1 %87  ;;  %v121_v46 = vsel %vm120_vm10, %v116_v41, 0.0 }
  0xc2   :  { %v114_v39 = vmax.f32 %v111_v36, 0.0  ;;  %v109_v40 = vadd.f32 0.2, %v97_v37  ;;  %vm103_vm11 = vcmp.le.f32.partialorder %v97_v37, -5e+29 }
  0xc3   :  { %vm100_vm12 = vcmp.ge.f32.partialorder %v88_v38, 5e+29 }
  0xc4   :  { %v117_v42 = vsel %vm105_vm9, 0.0, %v114_v39  ;;  %v112_v43 = vsub.f32 %v109_v40, %v88_v38  ;;  %vm106_vm13 = vmor %vm100_vm12, %vm103_vm11 }
  0xc5   :  { %v122_v44 = vsel %vm120_vm10, %v117_v42, 0.0 }
  0xc6   :  { %v115_v45 = vmax.f32 %v112_v43, 0.0  ;;  %v123_v48 = vadd.f32 %v122_v44, %v121_v46 }
  0xc8   :  { %v118_v47 = vsel %vm106_vm13, 0.0, %v115_v45 }
  0xc9   :  { %v124_v49 = vsel %vm120_vm10, %v118_v47, 0.0 }
  0xca   :  { %v125_v50 = vadd.f32 %v124_v49, %v123_v48 }
  0xcc   :  { %126 = vadd.xlane.f32.xlu0 %v125_v50 }
  0xcd   :  { %258 = shalt.err (!%p255_p6)
}
  0xce   :  { %s259_s18 = scalar_lea.hbm %s429_s3, 128 }
  0xcf   :  { %p260_p7 = scmp.ne.s32.totalorder %s429_s3, %s259_s18  ;;  %p263_p8 = scmp.lt.u32.totalorder %s259_s18, %s429_s3 }
  0xd1   :  { %p265_p9 = pnand %p263_p8, %p260_p7 }
  0xd3   :  { %268 = shalt.err (!%p265_p9)
}
  0xd4   :  { %167 = dma.vmem_to_hbm [thread:$0]  %s165_s14, 128, %s429_s3, [#allocation9]  }
  0xd5   :  { %s329_s25 = smov [#allocation10]  }
  0xd6   :  { %s174_s26 = sshll.u32 %s329_s25, 4  ;;  %s175_s26 = int_to_ptr.vmem [resolvable:$true] %s174_s26 }
  0xd7   :  { %s269_s27 = scalar_lea.vmem %s175_s26, 128  ;;  %p274_p11 = scmp.lt.s32.totalorder %s175_s26, %s175_s26 }
  0xd8   :  { %p270_p10 = scmp.ne.s32.totalorder %s175_s26, %s269_s27  ;;  %p275_p12 = scmp.lt.s32.totalorder %s269_s27, %s269_s27 }
  0xda   :  { %p276_p13 = por %p275_p12, %p274_p11 }
  0xdc   :  { %p277_p0 = pnand %p276_p13, %p270_p10 }
  0xde   :  { %280 = shalt.err (!%p277_p0)
}
  0xdf   :  { %s281_s30 = scalar_lea.hbm %s430_s4, 128 }
  0xe0   :  { %p282_p1 = scmp.ne.s32.totalorder %s430_s4, %s281_s30  ;;  %p285_p2 = scmp.lt.u32.totalorder %s281_s30, %s430_s4 }
  0xe2   :  { %p287_p3 = pnand %p285_p2, %p282_p1 }
  0xe4   :  { %290 = shalt.err (!%p287_p3)
}
  0xe5   :  { %177 = dma.vmem_to_hbm [thread:$0]  %s175_s26, 128, %s430_s4, [#allocation9]   ;;  %v119_v59 = vld [vmem:[#allocation7] sm:$0x1] }
  0xe6   :  { %s330_s10 = smov [#allocation7]  }
  0xe7   :  { %s154_s11 = sshll.u32 %s330_s10, 4  ;;  %s155_s11 = int_to_ptr.vmem [resolvable:$true] %s154_s11 }
  0xe8   :  { %s291_s0 = scalar_lea.vmem %s155_s11, 16  ;;  %s295_s13 = scalar_lea.vmem %s155_s11, 32 }
  0xe9   :  { %p292_p4 = scmp.ne.s32.totalorder %s155_s11, %s291_s0  ;;  %p296_p5 = scmp.lt.s32.totalorder %s155_s11, %s155_s11 }
  0xea   :  { %p297_p6 = scmp.lt.s32.totalorder %s295_s13, %s291_s0 }
  0xec   :  { %p298_p7 = por %p297_p6, %p296_p5 }
  0xee   :  { %p299_p8 = pnand %p298_p7, %p292_p4 }
 0x159   :  { %v127_v52 = vpop.xlane.xlu0 %126 }
 0x15a   :  { %v128_v53 = vrot.slane %v127_v52, 4 }
 0x15c   :  { %v129_v54 = vadd.f32 %v128_v53, %v127_v52 }
 0x15e   :  { %v130_v55 = vrot.slane %v129_v54, 2 }
 0x160   :  { %v131_v56 = vadd.f32 %v130_v55, %v129_v54 }
 0x162   :  { %v132_v57 = vrot.slane %v131_v56, 1 }
 0x164   :  { %v133_v58 = vadd.f32 %v132_v57, %v131_v56 }
 0x166   :  { %191 = vpush %v133_v58 }
 0x197   :  { %s192_s12 = spop %191 }
 0x198   :  { %v135_v60 = vstv %s192_s12 }
 0x199   :  { %v136_v61 = vadd.f32 %v135_v60, %v119_v59 }
 0x19b   :  { %137 = vst [vmem:[#allocation7] sm:$0x1] %v136_v61 }
 0x19c   :  { %302 = shalt.err (!%p299_p8)
}
 0x19d   :  { %s303_s14 = scalar_lea.hbm %s428_s2, 16 }
 0x19e   :  { %p304_p9 = scmp.ne.s32.totalorder %s428_s2, %s303_s14  ;;  %p307_p10 = scmp.lt.u32.totalorder %s303_s14, %s428_s2 }
 0x1a0   :  { %p309_p11 = pnand %p307_p10, %p304_p9 }
 0x1a2   :  { %312 = shalt.err (!%p309_p11)
}
 0x1a3   :  { %157 = dma.vmem_to_hbm [thread:$0]  %s155_s11, 16, %s428_s2, [#allocation4]  }
 0x1a4   :  { %317 = dma.done.wait [#allocation4], 16  }
 0x1a5   :  { %318 = vsyncadd [#allocation4], 4294967280 }
 0x1a6   :  { %319 = dma.done.wait [#allocation9], 256  }
 0x1a7   :  { %320 = vsyncadd [#allocation9], 4294967040 }
 0x1a8   :  { %187 = vsyncpa [#allocation3], 1 }
 0x1a9   :  { %188 = vsyncpa [#allocation6], 1 }
 0x1aa   :  { %189 = vsyncpa [#allocation4], 1 }
 0x1ab   :  { %190 = vsyncpa [#allocation9], 1 }

</bundles_post_ra>
